<compile_context>
chip_gen: v7x
topology: tpu7x:2x2x1
jax: 0.10.0
libtpu: 0.0.40
codegen_flags: <defaults>
</compile_context>

<pallas_src>
import functools

import jax
import jax.numpy as jnp
from jax.experimental import pallas as pl
from jax.experimental.pallas import tpu as pltpu


# ---------------------------------------------------------------------------
# Chip-aware VMEM budget / limit and tile choosers.
# ---------------------------------------------------------------------------
def _vmem_budget():
    cap = 64 << 20                        # conservative fallback (v7x per-core)
    try:
        info = pltpu.get_tpu_info()
        cap = int(getattr(info, "vmem_capacity_bytes", cap))
    except Exception:
        pass
    budget = min(cap * 3 // 8, 48 << 20)  # v5e/v6e -> 48 MiB, v7x -> 24 MiB
    limit = int(min(cap * 3 // 4, 100 << 20))
    return budget, limit


def _pick_query_tile(n, de, f, budget_bytes):
    """Largest query tile (multiple of 8 dividing n) whose per-step VMEM fits."""
    if n % 8 != 0:
        return n
    # per query row: edge dbuf (bf16 x2), adj dbuf (bf16 x2), cp scratch, softmax
    # temporaries (c / att / p / mask), plus the double-buffered output row.
    per_row = n * (2 * 2 * de + 2 * 2 + 4 + 16) + 2 * f * 4 + 16
    # independent of the tile: resident h double-buffer, per-chunk g, s2, weights.
    fixed = n * f * 4 * 2 + 8 * f * n * 4 + n * 8 + (8 * f) * (8 * de) * 2 + 4096
    avail = max(budget_bytes - fixed, 8 * per_row)
    tni = min(n, max(8, (avail // per_row) // 8 * 8))
    while n % tni:
        tni -= 8
    return tni


def _pick_norm_tile(n, bs, f, budget_bytes=4 << 20):
    if n % 8 != 0:
        return n
    per_row = bs * f * 4 * 2
    tn = min(n, max(8, (budget_bytes // max(per_row, 1)) // 8 * 8))
    while n % tn:
        tn -= 8
    return tn


# ---------------------------------------------------------------------------
# Kernel A: shared node projections, once per (batch, node).
#   hcat = x @ [wh | wh1@ah | wh2@ah] + [bh | bh1@ah + ah_b | bh2@ah]
#   h  = hcat[:, :F]          (values)
#   s1 = hcat[:, F]           (query-side pair score, ah_b folded in)
#   s2 = hcat[:, F+1]         (key-side pair score)
# ---------------------------------------------------------------------------
def _proj_kernel(x_ref, wcat_ref, bcat_ref, h_ref, s1_ref, s2_ref, *, n_out):
    hcat = jnp.dot(x_ref[0], wcat_ref[...],
                   preferred_element_type=jnp.float32) + bcat_ref[...]
    h_ref[0] = hcat[:, :n_out]
    s1_ref[0] = hcat[:, n_out:n_out + 1]
    s2_ref[0] = hcat[:, n_out + 1:n_out + 2]


# ---------------------------------------------------------------------------
# Kernel B: fused GAT + edge-feature attention for one (batch, query-tile).
#   Edge scores are computed lane-dense over keys, chunked over query rows:
#     g  = leaky( kron(I_R, wf^T) @ e_chunk + bf' )     (R*F, N) per chunk
#     cp = leaky( kron(I_R, af^T) @ g + af_b )          (R,   N) per chunk
#   c   = leaky(s1_i + s2_j) + cp
#   att = softmax(where(adj > 0, c, -9e15), axis=-1) ;  hp = att @ h
# ---------------------------------------------------------------------------
def _gat_efa_kernel(h_ref, s1_ref, s2_ref, e_ref, adjm_ref,
                    wblk_ref, bft_ref, sblk_ref, afb_ref,
                    out_ref, cp_ref, *, alpha, rows_per_chunk, de):
    leak = lambda v: jnp.where(v > 0, v, alpha * v)
    R = rows_per_chunk
    tni, n_kv = cp_ref.shape

    wblk = wblk_ref[...]                       # (R*F, R*De) bf16 block-diag wf^T
    bft = bft_ref[...]                         # (R*F, 1)   tiled bias
    sblk = sblk_ref[...]                       # (R, R*F)   block-diag af^T
    af_b = afb_ref[0, 0]                       # scalar (SMEM)

    def chunk_body(ci, carry):
        row0 = pl.multiple_of(ci * (R * de), R * de)
        q0 = pl.multiple_of(ci * R, R)
        e_flat = e_ref[0, pl.ds(row0, R * de), :]                    # (R*De, N) bf16
        g = leak(jnp.dot(wblk, e_flat,
                         preferred_element_type=jnp.float32) + bft)  # (R*F, N)
        s = jnp.dot(sblk, g, preferred_element_type=jnp.float32)     # (R, N)
        cp_ref[pl.ds(q0, R), :] = leak(s + af_b)
        return carry

    jax.lax.fori_loop(0, tni // R, chunk_body, 0)

    # pairwise GAT scores + edge scores, masked softmax over keys
    c = leak(s1_ref[0] + s2_ref[0]) + cp_ref[...]                    # (tni, N)
    att = jnp.where(adjm_ref[0] > 0, c, jnp.float32(-9e15))
    m = jnp.max(att, axis=-1, keepdims=True)
    p = jnp.exp(att - m)
    att = p * pl.reciprocal(jnp.sum(p, axis=-1, keepdims=True), approx=True)

    out_ref[0] = jnp.dot(att, h_ref[0], preferred_element_type=jnp.float32)


# ---------------------------------------------------------------------------
# Kernel C: per-node normalization over (batch, feature), tiled over nodes.
# ---------------------------------------------------------------------------
def _norm_kernel(hp_ref, out_ref, *, alpha, lastact):
    hp = hp_ref[...]                                       # (bs, TN, F)
    m = jnp.mean(hp, axis=2, keepdims=True)                # (bs, TN, 1)
    m = jnp.mean(m, axis=0, keepdims=True)                 # (1, TN, 1)
    v = jnp.mean((hp - m) ** 2, axis=2, keepdims=True)
    v = jnp.mean(v, axis=0, keepdims=True)
    out = (hp - m) * jax.lax.rsqrt(1e-5 + v)
    if lastact:
        out = jnp.where(out > 0, out, alpha * out)
    out_ref[...] = out


# ---------------------------------------------------------------------------
# Wrapper: algebraic weight folding + the three pallas_calls.
# ---------------------------------------------------------------------------
def gat_efa_forward(params, x, edge_feat, adj, *, alpha, lastact=False):
    bs, N, Din = x.shape
    De = edge_feat.shape[-1]
    F = params["wh_w"].shape[1]
    hi = jax.lax.Precision.HIGHEST

    # Fold ah into wh1/wh2: h1/h2 are only consumed through the rank-1 ah matvec.
    v1 = jnp.matmul(params["wh1_w"], params["ah_w"], precision=hi)            # (Din, 1)
    v2 = jnp.matmul(params["wh2_w"], params["ah_w"], precision=hi)            # (Din, 1)
    b1 = jnp.matmul(params["wh1_b"], params["ah_w"], precision=hi) + params["ah_b"]
    b2 = jnp.matmul(params["wh2_b"], params["ah_w"], precision=hi)
    w_cat = jnp.concatenate([params["wh_w"], v1, v2], axis=1)                 # (Din, F+2)
    b_cat = jnp.concatenate([params["wh_b"], b1, b2], axis=1)                 # (1, F+2)

    # ---- shared node projections, once per (batch, node) -------------------
    h, s1, s2col = pl.pallas_call(
        functools.partial(_proj_kernel, n_out=F),
        out_shape=(jax.ShapeDtypeStruct((bs, N, F), jnp.float32),
                   jax.ShapeDtypeStruct((bs, N, 1), jnp.float32),
                   jax.ShapeDtypeStruct((bs, N, 1), jnp.float32)),
        grid=(bs,),
        in_specs=[pl.BlockSpec((1, N, Din), lambda b: (b, 0, 0)),
                  pl.BlockSpec((Din, F + 2), lambda b: (0, 0)),
                  pl.BlockSpec((1, F + 2), lambda b: (0, 0))],
        out_specs=(pl.BlockSpec((1, N, F), lambda b: (b, 0, 0)),
                   pl.BlockSpec((1, N, 1), lambda b: (b, 0, 0)),
                   pl.BlockSpec((1, N, 1), lambda b: (b, 0, 0))),
        compiler_params=pltpu.CompilerParams(dimension_semantics=("parallel",)),
    )(x, w_cat, b_cat)
    s2 = s2col.reshape(bs, 1, N)                   # lane-dense key-score row

    # ---- edge / adjacency prep: bf16, key axis (N) on lanes ----------------
    # (bs, N, N, De) -> (bs, N, De, N) -> (bs, N*De, N); kernel slices R*De rows
    # per query-row chunk with no in-kernel relayout.
    e_t = jnp.swapaxes(edge_feat.astype(jnp.bfloat16), 2, 3).reshape(bs, N * De, N)
    adjm = (adj > 0).astype(jnp.bfloat16)                                     # 0/1 mask

    budget, vmem_limit = _vmem_budget()
    tni = _pick_query_tile(N, De, F, budget)
    R = 8 if tni % 8 == 0 else 1                   # query rows per in-kernel chunk

    wfT = jnp.transpose(params["wf_w"])                                       # (F, De)
    w_blk = jnp.kron(jnp.eye(R, dtype=jnp.float32), wfT).astype(jnp.bfloat16) # (R*F, R*De)
    bf_col = jnp.transpose(params["wf_b"] + params["bf"])                     # (F, 1)
    bf_tile = jnp.tile(bf_col, (R, 1))                                        # (R*F, 1)
    af_row = jnp.transpose(params["af_w"])                                    # (1, F)
    s_blk = jnp.kron(jnp.eye(R, dtype=jnp.float32), af_row)                   # (R, R*F)
    af_b = params["af_b"].reshape(1, 1)                                       # SMEM scalar

    hp = pl.pallas_call(
        functools.partial(_gat_efa_kernel, alpha=alpha, rows_per_chunk=R, de=De),
        out_shape=jax.ShapeDtypeStruct((bs, N, F), jnp.float32),
        grid=(bs, N // tni),
        in_specs=[
            pl.BlockSpec((1, N, F), lambda b, i: (b, 0, 0)),         # h (values)
            pl.BlockSpec((1, tni, 1), lambda b, i: (b, i, 0)),       # s1 (query col)
            pl.BlockSpec((1, 1, N), lambda b, i: (b, 0, 0)),         # s2 (key row)
            pl.BlockSpec((1, tni * De, N), lambda b, i: (b, i, 0)),  # edges bf16
            pl.BlockSpec((1, tni, N), lambda b, i: (b, i, 0)),       # adj mask bf16
            pl.BlockSpec((R * F, R * De), lambda b, i: (0, 0)),      # kron(I, wf^T)
            pl.BlockSpec((R * F, 1), lambda b, i: (0, 0)),           # tiled bias
            pl.BlockSpec((R, R * F), lambda b, i: (0, 0)),           # kron(I, af^T)
            pl.BlockSpec(memory_space=pltpu.MemorySpace.SMEM),       # af_b scalar
        ],
        out_specs=pl.BlockSpec((1, tni, F), lambda b, i: (b, i, 0)),
        scratch_shapes=[pltpu.VMEM((tni, N), jnp.float32)],          # cp rows
        compiler_params=pltpu.CompilerParams(
            dimension_semantics=("parallel", "parallel"),
            vmem_limit_bytes=vmem_limit),
    )(h, s1, s2, e_t, adjm, w_blk, bf_tile, s_blk, af_b)

    # ---- per-node normalization over (batch, feature) ----------------------
    tn = _pick_norm_tile(N, bs, F)
    out = pl.pallas_call(
        functools.partial(_norm_kernel, alpha=alpha, lastact=lastact),
        out_shape=jax.ShapeDtypeStruct((bs, N, F), jnp.float32),
        grid=(N // tn,),
        in_specs=[pl.BlockSpec((bs, tn, F), lambda i: (0, i, 0))],
        out_specs=pl.BlockSpec((bs, tn, F), lambda i: (0, i, 0)),
        compiler_params=pltpu.CompilerParams(dimension_semantics=("parallel",)),
    )(hp)
    return out


# ---------------------------------------------------------------------------
# Pure-JAX reference (mirrors the PyTorch forward semantics exactly; uses the
# un-folded f32 parameters, so it also validates the algebraic weight folding).
# ---------------------------------------------------------------------------
def reference_forward(params, x, edge_feat, adj, *, alpha, lastact=False):
    dot = functools.partial(jnp.matmul, precision=jax.lax.Precision.HIGHEST)
    leaky = lambda v: jnp.where(v > 0, v, alpha * v)

    h = dot(x, params["wh_w"]) + params["wh_b"]
    h1 = dot(x, params["wh1_w"]) + params["wh1_b"]
    h2 = dot(x, params["wh2_w"]) + params["wh2_b"]
    ah_in = h1[:, :, None, :] + h2[:, None, :, :]
    c = leaky(jnp.squeeze(dot(ah_in, params["ah_w"]) + params["ah_b"], -1))

    f = dot(edge_feat, params["wf_w"]) + params["wf_b"] + params["bf"]
    cp = jnp.squeeze(dot(leaky(f), params["af_w"]) + params["af_b"], -1)
    cp = leaky(cp)
    c = c + cp

    att = jnp.where(adj > 0, c, jnp.float32(-9e15))
    att = jax.nn.softmax(att, axis=-1)
    hp = dot(att, h)

    mean_h = hp.mean(axis=(0, 2))[:, None]
    var_h = hp.var(axis=(0, 2))[:, None]          # unbiased=False
    hp = (hp - mean_h) / jnp.sqrt(1e-5 + var_h)
    return leaky(hp) if lastact else hp


# ---------------------------------------------------------------------------
# Deterministic parameter initialization (shapes from the module __init__)
# ---------------------------------------------------------------------------
def init_params(key, in_features, in_edge_features, out_features):
    ks = jax.random.split(key, 13)

    def lin(kw, kb, fan_in, fan_out):
        w = jax.random.normal(kw, (fan_in, fan_out), jnp.float32) / jnp.sqrt(
            jnp.float32(fan_in))
        b = jax.random.normal(kb, (1, fan_out), jnp.float32) * 0.05
        return w, b

    wh_w, wh_b = lin(ks[0], ks[1], in_features, out_features)
    wh1_w, wh1_b = lin(ks[2], ks[3], in_features, out_features)
    wh2_w, wh2_b = lin(ks[4], ks[5], in_features, out_features)
    ah_w, ah_b = lin(ks[6], ks[7], out_features, 1)
    wf_w, wf_b = lin(ks[8], ks[9], in_edge_features, out_features)
    af_w, af_b = lin(ks[10], ks[11], out_features, 1)
    bf = jax.random.normal(ks[12], (1, out_features), jnp.float32) * 0.1
    return dict(wh_w=wh_w, wh_b=wh_b, wh1_w=wh1_w, wh1_b=wh1_b,
                wh2_w=wh2_w, wh2_b=wh2_b, ah_w=ah_w, ah_b=ah_b,
                wf_w=wf_w, wf_b=wf_b, af_w=af_w, af_b=af_b, bf=bf)


if __name__ == "__main__":
    bs, N = 2, 8
    in_features, in_edge_features, out_features = 16, 8, 32
    alpha = 0.2          # LeakyReLU negative slope
    lastact = False      # dropout attr exists in the module but is unused in forward

    key = jax.random.PRNGKey(0)
    kp, kx, ke, ka = jax.random.split(key, 4)
    params = init_params(kp, in_features, in_edge_features, out_features)
    x = jax.random.normal(kx, (bs, N, in_features), jnp.float32)
    edge_feat = jax.random.normal(ke, (bs, N, N, in_edge_features), jnp.float32)
    adj = (jax.random.uniform(ka, (bs, N, N)) > 0.4).astype(jnp.float32)

    fwd = jax.jit(functools.partial(gat_efa_forward, alpha=alpha, lastact=lastact))
    out = jax.block_until_ready(fwd(params, x, edge_feat, adj))
    assert out.shape == (bs, N, out_features)

    ref = reference_forward(params, x, edge_feat, adj, alpha=alpha, lastact=lastact)
    # bf16 edge stream + approx reciprocal introduce ~1e-2-level differences.
    if not jnp.allclose(out, ref, rtol=2e-2, atol=2e-2):
        raise AssertionError(
            f"kernel/reference mismatch, max abs err = {jnp.max(jnp.abs(out - ref))}")

    print("KERNEL_OK")
</pallas_src>

<mosaic_0001>
module attributes {stable_mosaic.version = 11 : i64} {
  func.func @_proj_kernel(%arg0: i32, %arg1: memref<1x8x16xf32, #tpu.memory_space<vmem>>, %arg2: memref<16x34xf32, #tpu.memory_space<vmem>>, %arg3: memref<1x34xf32, #tpu.memory_space<vmem>>, %arg4: memref<1x8x32xf32, #tpu.memory_space<vmem>>, %arg5: memref<1x8x1xf32, #tpu.memory_space<vmem>>, %arg6: memref<1x8x1xf32, #tpu.memory_space<vmem>>) attributes {dimension_semantics = [#tpu.dimension_semantics<parallel>], iteration_bounds = array<i64: 2>, scalar_prefetch = 0 : i64, scratch_operands = 0 : i64, tpu.core_type = #tpu.core_type<tc>, window_params = [{transform_indices = @transform_0, window_bounds = array<i64: 1, 8, 16>}, {pipeline_mode = #tpu.pipeline_mode<synchronous>, transform_indices = @transform_1, window_bounds = array<i64: 16, 34>}, {pipeline_mode = #tpu.pipeline_mode<synchronous>, transform_indices = @transform_2, window_bounds = array<i64: 1, 34>}, {transform_indices = @transform_3, window_bounds = array<i64: 1, 8, 32>}, {transform_indices = @transform_4, window_bounds = array<i64: 1, 8, 1>}, {transform_indices = @transform_5, window_bounds = array<i64: 1, 8, 1>}]} {
    %c0 = arith.constant 0 : index
    %c0_0 = arith.constant 0 : index
    %c0_1 = arith.constant 0 : index
    %0 = vector.load %arg1[%c0, %c0_0, %c0_1] : memref<1x8x16xf32, #tpu.memory_space<vmem>>, vector<1x8x16xf32>
    %1 = vector.shape_cast %0 : vector<1x8x16xf32> to vector<8x16xf32>
    %c0_2 = arith.constant 0 : index
    %c0_3 = arith.constant 0 : index
    %2 = vector.load %arg2[%c0_2, %c0_3] : memref<16x34xf32, #tpu.memory_space<vmem>>, vector<16x34xf32>
    %cst = arith.constant dense<0.000000e+00> : vector<8x34xf32>
    %3 = tpu.matmul %1, %2, %cst {dimension_numbers = #tpu.dot_dimension_numbers<[1], [0], [0], [1], [0, 0, 1, 1], [], []>} : vector<8x16xf32>, vector<16x34xf32>, vector<8x34xf32> -> vector<8x34xf32>
    %c0_4 = arith.constant 0 : index
    %c0_5 = arith.constant 0 : index
    %4 = vector.load %arg3[%c0_4, %c0_5] : memref<1x34xf32, #tpu.memory_space<vmem>>, vector<1x34xf32>
    %5 = vector.broadcast %4 : vector<1x34xf32> to vector<8x34xf32>
    %6 = arith.addf %3, %5 : vector<8x34xf32>
    %7 = vector.extract_strided_slice %6 {offsets = [0, 0], sizes = [8, 32], strides = [1, 1]} : vector<8x34xf32> to vector<8x32xf32>
    %c0_6 = arith.constant 0 : index
    %c0_7 = arith.constant 0 : index
    %c0_8 = arith.constant 0 : index
    %8 = vector.load %arg4[%c0_6, %c0_7, %c0_8] : memref<1x8x32xf32, #tpu.memory_space<vmem>>, vector<1x8x32xf32>
    %9 = vector.shape_cast %8 : vector<1x8x32xf32> to vector<8x32xf32>
    %10 = vector.shape_cast %7 : vector<8x32xf32> to vector<1x8x32xf32>
    tpu.vector_store %arg4[%c0_6, %c0_7, %c0_8], %10 {strides = array<i32>} : memref<1x8x32xf32, #tpu.memory_space<vmem>>, vector<1x8x32xf32>,
    %11 = vector.extract_strided_slice %6 {offsets = [0, 32], sizes = [8, 1], strides = [1, 1]} : vector<8x34xf32> to vector<8x1xf32>
    %c0_9 = arith.constant 0 : index
    %c0_10 = arith.constant 0 : index
    %c0_11 = arith.constant 0 : index
    %12 = vector.load %arg5[%c0_9, %c0_10, %c0_11] : memref<1x8x1xf32, #tpu.memory_space<vmem>>, vector<1x8x1xf32>
    %13 = vector.shape_cast %12 : vector<1x8x1xf32> to vector<8x1xf32>
    %14 = vector.shape_cast %11 : vector<8x1xf32> to vector<1x8x1xf32>
    tpu.vector_store %arg5[%c0_9, %c0_10, %c0_11], %14 {strides = array<i32>} : memref<1x8x1xf32, #tpu.memory_space<vmem>>, vector<1x8x1xf32>,
    %15 = vector.extract_strided_slice %6 {offsets = [0, 33], sizes = [8, 1], strides = [1, 1]} : vector<8x34xf32> to vector<8x1xf32>
    %c0_12 = arith.constant 0 : index
    %c0_13 = arith.constant 0 : index
    %c0_14 = arith.constant 0 : index
    %16 = vector.load %arg6[%c0_12, %c0_13, %c0_14] : memref<1x8x1xf32, #tpu.memory_space<vmem>>, vector<1x8x1xf32>
    %17 = vector.shape_cast %16 : vector<1x8x1xf32> to vector<8x1xf32>
    %18 = vector.shape_cast %15 : vector<8x1xf32> to vector<1x8x1xf32>
    tpu.vector_store %arg6[%c0_12, %c0_13, %c0_14], %18 {strides = array<i32>} : memref<1x8x1xf32, #tpu.memory_space<vmem>>, vector<1x8x1xf32>,
    return
  }
  func.func @transform_0(%arg0: i32) -> (i32, i32, i32) {
    %c0_i32 = arith.constant 0 : i32
    %c0_i32_0 = arith.constant 0 : i32
    %c0_i32_1 = arith.constant 0 : i32
    return %arg0, %c0_i32, %c0_i32_0 : i32, i32, i32
  }
  func.func @transform_1(%arg0: i32) -> (i32, i32) {
    %c0_i32 = arith.constant 0 : i32
    %c0_i32_0 = arith.constant 0 : i32
    %c0_i32_1 = arith.constant 0 : i32
    return %c0_i32, %c0_i32_0 : i32, i32
  }
  func.func @transform_2(%arg0: i32) -> (i32, i32) {
    %c0_i32 = arith.constant 0 : i32
    %c0_i32_0 = arith.constant 0 : i32
    %c0_i32_1 = arith.constant 0 : i32
    return %c0_i32, %c0_i32_0 : i32, i32
  }
  func.func @transform_3(%arg0: i32) -> (i32, i32, i32) {
    %c0_i32 = arith.constant 0 : i32
    %c0_i32_0 = arith.constant 0 : i32
    %c0_i32_1 = arith.constant 0 : i32
    return %arg0, %c0_i32, %c0_i32_0 : i32, i32, i32
  }
  func.func @transform_4(%arg0: i32) -> (i32, i32, i32) {
    %c0_i32 = arith.constant 0 : i32
    %c0_i32_0 = arith.constant 0 : i32
    %c0_i32_1 = arith.constant 0 : i32
    return %arg0, %c0_i32, %c0_i32_0 : i32, i32, i32
  }
  func.func @transform_5(%arg0: i32) -> (i32, i32, i32) {
    %c0_i32 = arith.constant 0 : i32
    %c0_i32_0 = arith.constant 0 : i32
    %c0_i32_1 = arith.constant 0 : i32
    return %arg0, %c0_i32, %c0_i32_0 : i32, i32, i32
  }
}

module attributes {stable_mosaic.version = 11 : i64} {
  func.func @_gat_efa_kernel(%arg0: i32, %arg1: i32, %arg2: memref<1x8x32xf32, #tpu.memory_space<vmem>>, %arg3: memref<1x8x1xf32, #tpu.memory_space<vmem>>, %arg4: memref<1x1x8xf32, #tpu.memory_space<vmem>>, %arg5: memref<1x64x8xbf16, #tpu.memory_space<vmem>>, %arg6: memref<1x8x8xbf16, #tpu.memory_space<vmem>>, %arg7: memref<256x64xbf16, #tpu.memory_space<vmem>>, %arg8: memref<256x1xf32, #tpu.memory_space<vmem>>, %arg9: memref<8x256xf32, #tpu.memory_space<vmem>>, %arg10: memref<1x1xf32, #tpu.memory_space<smem>>, %arg11: memref<1x8x32xf32, #tpu.memory_space<vmem>>, %arg12: memref<8x8xf32, #tpu.memory_space<vmem>>) attributes {dimension_semantics = [#tpu.dimension_semantics<parallel>, #tpu.dimension_semantics<parallel>], iteration_bounds = array<i64: 2, 1>, scalar_prefetch = 0 : i64, scratch_operands = 1 : i64, tpu.core_type = #tpu.core_type<tc>, window_params = [{transform_indices = @transform_0, window_bounds = array<i64: 1, 8, 32>}, {transform_indices = @transform_1, window_bounds = array<i64: 1, 8, 1>}, {transform_indices = @transform_2, window_bounds = array<i64: 1, 1, 8>}, {transform_indices = @transform_3, window_bounds = array<i64: 1, 64, 8>}, {transform_indices = @transform_4, window_bounds = array<i64: 1, 8, 8>}, {pipeline_mode = #tpu.pipeline_mode<synchronous>, transform_indices = @transform_5, window_bounds = array<i64: 256, 64>}, {pipeline_mode = #tpu.pipeline_mode<synchronous>, transform_indices = @transform_6, window_bounds = array<i64: 256, 1>}, {pipeline_mode = #tpu.pipeline_mode<synchronous>, transform_indices = @transform_7, window_bounds = array<i64: 8, 256>}, {transform_indices = @transform_8, window_bounds = array<i64: 1, 1>}, {transform_indices = @transform_9, window_bounds = array<i64: 1, 8, 32>}]} {
    %c0 = arith.constant 0 : index
    %c0_0 = arith.constant 0 : index
    %0 = vector.load %arg7[%c0, %c0_0] : memref<256x64xbf16, #tpu.memory_space<vmem>>, vector<256x64xbf16>
    %c0_1 = arith.constant 0 : index
    %c0_2 = arith.constant 0 : index
    %1 = vector.load %arg8[%c0_1, %c0_2] : memref<256x1xf32, #tpu.memory_space<vmem>>, vector<256x1xf32>
    %c0_3 = arith.constant 0 : index
    %c0_4 = arith.constant 0 : index
    %2 = vector.load %arg9[%c0_3, %c0_4] : memref<8x256xf32, #tpu.memory_space<vmem>>, vector<8x256xf32>
    %c0_5 = arith.constant 0 : index
    %c0_6 = arith.constant 0 : index
    %3 = memref.load %arg10[%c0_5, %c0_6] : memref<1x1xf32, #tpu.memory_space<smem>>
    %c0_i32 = arith.constant 0 : i32
    %c64_i32 = arith.constant 64 : i32
    %4 = arith.muli %c0_i32, %c64_i32 : i32
    %5 = tpu.assume_multiple %4, 64 : i32
    %c8_i32 = arith.constant 8 : i32
    %6 = arith.muli %c0_i32, %c8_i32 : i32
    %7 = tpu.assume_multiple %6, 8 : i32
    %c0_7 = arith.constant 0 : index
    %8 = arith.index_cast %5 : i32 to index
    %c0_8 = arith.constant 0 : index
    %9 = vector.load %arg5[%c0_7, %8, %c0_8] : memref<1x64x8xbf16, #tpu.memory_space<vmem>>, vector<1x64x8xbf16>
    %10 = vector.shape_cast %9 : vector<1x64x8xbf16> to vector<64x8xbf16>
    %cst = arith.constant dense<0.000000e+00> : vector<256x8xf32>
    %11 = tpu.matmul %0, %10, %cst {dimension_numbers = #tpu.dot_dimension_numbers<[1], [0], [0], [1], [0, 0, 1, 1], [], []>} : vector<256x64xbf16>, vector<64x8xbf16>, vector<256x8xf32> -> vector<256x8xf32>
    %12 = vector.broadcast %1 : vector<256x1xf32> to vector<256x8xf32>
    %13 = arith.addf %11, %12 : vector<256x8xf32>
    %cst_9 = arith.constant 0.000000e+00 : f32
    %14 = vector.broadcast %cst_9 : f32 to vector<256x8xf32>
    %15 = arith.cmpf ogt, %13, %14 : vector<256x8xf32>
    %cst_10 = arith.constant 2.000000e-01 : f32
    %16 = vector.broadcast %cst_10 : f32 to vector<256x8xf32>
    %17 = arith.mulf %16, %13 : vector<256x8xf32>
    %18 = arith.select %15, %13, %17 : vector<256x8xi1>, vector<256x8xf32>
    %cst_11 = arith.constant dense<0.000000e+00> : vector<8x8xf32>
    %19 = tpu.matmul %2, %18, %cst_11 {dimension_numbers = #tpu.dot_dimension_numbers<[1], [0], [0], [1], [0, 0, 1, 1], [], []>} : vector<8x256xf32>, vector<256x8xf32>, vector<8x8xf32> -> vector<8x8xf32>
    %20 = vector.broadcast %3 : f32 to vector<8x8xf32>
    %21 = arith.addf %19, %20 : vector<8x8xf32>
    %cst_12 = arith.constant 0.000000e+00 : f32
    %22 = vector.broadcast %cst_12 : f32 to vector<8x8xf32>
    %23 = arith.cmpf ogt, %21, %22 : vector<8x8xf32>
    %cst_13 = arith.constant 2.000000e-01 : f32
    %24 = vector.broadcast %cst_13 : f32 to vector<8x8xf32>
    %25 = arith.mulf %24, %21 : vector<8x8xf32>
    %26 = arith.select %23, %21, %25 : vector<8x8xi1>, vector<8x8xf32>
    %27 = arith.index_cast %7 : i32 to index
    %c0_14 = arith.constant 0 : index
    %28 = vector.load %arg12[%27, %c0_14] : memref<8x8xf32, #tpu.memory_space<vmem>>, vector<8x8xf32>
    tpu.vector_store %arg12[%27, %c0_14], %26 {strides = array<i32>} : memref<8x8xf32, #tpu.memory_space<vmem>>, vector<8x8xf32>,
    %c1_i32 = arith.constant 1 : i32
    %c0_15 = arith.constant 0 : index
    %c0_16 = arith.constant 0 : index
    %c0_17 = arith.constant 0 : index
    %29 = vector.load %arg3[%c0_15, %c0_16, %c0_17] : memref<1x8x1xf32, #tpu.memory_space<vmem>>, vector<1x8x1xf32>
    %30 = vector.shape_cast %29 : vector<1x8x1xf32> to vector<8x1xf32>
    %c0_18 = arith.constant 0 : index
    %c0_19 = arith.constant 0 : index
    %c0_20 = arith.constant 0 : index
    %31 = vector.load %arg4[%c0_18, %c0_19, %c0_20] : memref<1x1x8xf32, #tpu.memory_space<vmem>>, vector<1x1x8xf32>
    %32 = vector.shape_cast %31 : vector<1x1x8xf32> to vector<1x8xf32>
    %33 = vector.broadcast %30 : vector<8x1xf32> to vector<8x8xf32>
    %34 = vector.broadcast %32 : vector<1x8xf32> to vector<8x8xf32>
    %35 = arith.addf %33, %34 : vector<8x8xf32>
    %cst_21 = arith.constant 0.000000e+00 : f32
    %36 = vector.broadcast %cst_21 : f32 to vector<8x8xf32>
    %37 = arith.cmpf ogt, %35, %36 : vector<8x8xf32>
    %cst_22 = arith.constant 2.000000e-01 : f32
    %38 = vector.broadcast %cst_22 : f32 to vector<8x8xf32>
    %39 = arith.mulf %38, %35 : vector<8x8xf32>
    %40 = arith.select %37, %35, %39 : vector<8x8xi1>, vector<8x8xf32>
    %c0_23 = arith.constant 0 : index
    %c0_24 = arith.constant 0 : index
    %41 = vector.load %arg12[%c0_23, %c0_24] : memref<8x8xf32, #tpu.memory_space<vmem>>, vector<8x8xf32>
    %42 = arith.addf %40, %41 : vector<8x8xf32>
    %c0_25 = arith.constant 0 : index
    %c0_26 = arith.constant 0 : index
    %c0_27 = arith.constant 0 : index
    %43 = vector.load %arg6[%c0_25, %c0_26, %c0_27] : memref<1x8x8xbf16, #tpu.memory_space<vmem>>, vector<1x8x8xbf16>
    %44 = vector.shape_cast %43 : vector<1x8x8xbf16> to vector<8x8xbf16>
    %cst_28 = arith.constant 0.000000e+00 : bf16
    %45 = vector.broadcast %cst_28 : bf16 to vector<8x8xbf16>
    %46 = arith.cmpf ogt, %44, %45 : vector<8x8xbf16>
    %cst_29 = arith.constant -9.000000e+15 : f32
    %47 = vector.broadcast %cst_29 : f32 to vector<8x8xf32>
    %48 = arith.select %46, %42, %47 : vector<8x8xi1>, vector<8x8xf32>
    %cst_30 = arith.constant dense<0xFF800000> : vector<8xf32>
    %49 = vector.multi_reduction <maximumf>, %48, %cst_30 [1] : vector<8x8xf32> to vector<8xf32>
    %50 = vector.shape_cast %49 : vector<8xf32> to vector<8x1xf32>
    %51 = vector.broadcast %50 : vector<8x1xf32> to vector<8x8xf32>
    %52 = arith.subf %48, %51 : vector<8x8xf32>
    %53 = math.exp %52 : vector<8x8xf32>
    %cst_31 = arith.constant dense<0.000000e+00> : vector<8xf32>
    %54 = vector.multi_reduction <add>, %53, %cst_31 [1] : vector<8x8xf32> to vector<8xf32>
    %55 = vector.shape_cast %54 : vector<8xf32> to vector<8x1xf32>
    %56 = tpu.reciprocal %55 {approx = true} : vector<8x1xf32> -> vector<8x1xf32>
    %57 = vector.broadcast %56 : vector<8x1xf32> to vector<8x8xf32>
    %58 = arith.mulf %53, %57 : vector<8x8xf32>
    %c0_32 = arith.constant 0 : index
    %c0_33 = arith.constant 0 : index
    %c0_34 = arith.constant 0 : index
    %59 = vector.load %arg2[%c0_32, %c0_33, %c0_34] : memref<1x8x32xf32, #tpu.memory_space<vmem>>, vector<1x8x32xf32>
    %60 = vector.shape_cast %59 : vector<1x8x32xf32> to vector<8x32xf32>
    %cst_35 = arith.constant dense<0.000000e+00> : vector<8x32xf32>
    %61 = tpu.matmul %58, %60, %cst_35 {dimension_numbers = #tpu.dot_dimension_numbers<[1], [0], [0], [1], [0, 0, 1, 1], [], []>} : vector<8x8xf32>, vector<8x32xf32>, vector<8x32xf32> -> vector<8x32xf32>
    %c0_36 = arith.constant 0 : index
    %c0_37 = arith.constant 0 : index
    %c0_38 = arith.constant 0 : index
    %62 = vector.load %arg11[%c0_36, %c0_37, %c0_38] : memref<1x8x32xf32, #tpu.memory_space<vmem>>, vector<1x8x32xf32>
    %63 = vector.shape_cast %62 : vector<1x8x32xf32> to vector<8x32xf32>
    %64 = vector.shape_cast %61 : vector<8x32xf32> to vector<1x8x32xf32>
    tpu.vector_store %arg11[%c0_36, %c0_37, %c0_38], %64 {strides = array<i32>} : memref<1x8x32xf32, #tpu.memory_space<vmem>>, vector<1x8x32xf32>,
    return
  }
  func.func @transform_0(%arg0: i32, %arg1: i32) -> (i32, i32, i32) {
    %c0_i32 = arith.constant 0 : i32
    %c0_i32_0 = arith.constant 0 : i32
    %c0_i32_1 = arith.constant 0 : i32
    return %arg0, %c0_i32, %c0_i32_0 : i32, i32, i32
  }
  func.func @transform_1(%arg0: i32, %arg1: i32) -> (i32, i32, i32) {
    %c0_i32 = arith.constant 0 : i32
    %c0_i32_0 = arith.constant 0 : i32
    return %arg0, %arg1, %c0_i32 : i32, i32, i32
  }
  func.func @transform_2(%arg0: i32, %arg1: i32) -> (i32, i32, i32) {
    %c0_i32 = arith.constant 0 : i32
    %c0_i32_0 = arith.constant 0 : i32
    %c0_i32_1 = arith.constant 0 : i32
    return %arg0, %c0_i32, %c0_i32_0 : i32, i32, i32
  }
  func.func @transform_3(%arg0: i32, %arg1: i32) -> (i32, i32, i32) {
    %c0_i32 = arith.constant 0 : i32
    %c0_i32_0 = arith.constant 0 : i32
    return %arg0, %arg1, %c0_i32 : i32, i32, i32
  }
  func.func @transform_4(%arg0: i32, %arg1: i32) -> (i32, i32, i32) {
    %c0_i32 = arith.constant 0 : i32
    %c0_i32_0 = arith.constant 0 : i32
    return %arg0, %arg1, %c0_i32 : i32, i32, i32
  }
  func.func @transform_5(%arg0: i32, %arg1: i32) -> (i32, i32) {
    %c0_i32 = arith.constant 0 : i32
    %c0_i32_0 = arith.constant 0 : i32
    %c0_i32_1 = arith.constant 0 : i32
    return %c0_i32, %c0_i32_0 : i32, i32
  }
  func.func @transform_6(%arg0: i32, %arg1: i32) -> (i32, i32) {
    %c0_i32 = arith.constant 0 : i32
    %c0_i32_0 = arith.constant 0 : i32
    %c0_i32_1 = arith.constant 0 : i32
    return %c0_i32, %c0_i32_0 : i32, i32
  }
  func.func @transform_7(%arg0: i32, %arg1: i32) -> (i32, i32) {
    %c0_i32 = arith.constant 0 : i32
    %c0_i32_0 = arith.constant 0 : i32
    %c0_i32_1 = arith.constant 0 : i32
    return %c0_i32, %c0_i32_0 : i32, i32
  }
  func.func @transform_8(%arg0: i32, %arg1: i32) -> (i32, i32) {
    %c0_i32 = arith.constant 0 : i32
    %c0_i32_0 = arith.constant 0 : i32
    %c0_i32_1 = arith.constant 0 : i32
    return %c0_i32, %c0_i32_0 : i32, i32
  }
  func.func @transform_9(%arg0: i32, %arg1: i32) -> (i32, i32, i32) {
    %c0_i32 = arith.constant 0 : i32
    %c0_i32_0 = arith.constant 0 : i32
    return %arg0, %arg1, %c0_i32 : i32, i32, i32
  }
}

module attributes {stable_mosaic.version = 11 : i64} {
  func.func @_norm_kernel(%arg0: i32, %arg1: memref<2x8x32xf32, #tpu.memory_space<vmem>>, %arg2: memref<2x8x32xf32, #tpu.memory_space<vmem>>) attributes {dimension_semantics = [#tpu.dimension_semantics<parallel>], iteration_bounds = array<i64: 1>, scalar_prefetch = 0 : i64, scratch_operands = 0 : i64, tpu.core_type = #tpu.core_type<tc>, window_params = [{transform_indices = @transform_0, window_bounds = array<i64: 2, 8, 32>}, {transform_indices = @transform_1, window_bounds = array<i64: 2, 8, 32>}]} {
    %c0 = arith.constant 0 : index
    %c0_0 = arith.constant 0 : index
    %c0_1 = arith.constant 0 : index
    %0 = vector.load %arg1[%c0, %c0_0, %c0_1] : memref<2x8x32xf32, #tpu.memory_space<vmem>>, vector<2x8x32xf32>
    %cst = arith.constant dense<0.000000e+00> : vector<2x8xf32>
    %1 = vector.multi_reduction <add>, %0, %cst [2] : vector<2x8x32xf32> to vector<2x8xf32>
    %2 = vector.shape_cast %1 : vector<2x8xf32> to vector<2x8x1xf32>
    %cst_2 = arith.constant 3.200000e+01 : f32
    %3 = vector.broadcast %cst_2 : f32 to vector<2x8x1xf32>
    %4 = arith.divf %2, %3 : vector<2x8x1xf32>
    %cst_3 = arith.constant dense<0.000000e+00> : vector<8x1xf32>
    %5 = vector.multi_reduction <add>, %4, %cst_3 [0] : vector<2x8x1xf32> to vector<8x1xf32>
    %6 = vector.shape_cast %5 : vector<8x1xf32> to vector<1x8x1xf32>
    %cst_4 = arith.constant 2.000000e+00 : f32
    %7 = vector.broadcast %cst_4 : f32 to vector<1x8x1xf32>
    %8 = arith.divf %6, %7 : vector<1x8x1xf32>
    %9 = vector.broadcast %8 : vector<1x8x1xf32> to vector<2x8x32xf32>
    %10 = arith.subf %0, %9 : vector<2x8x32xf32>
    %11 = arith.mulf %10, %10 : vector<2x8x32xf32>
    %cst_5 = arith.constant dense<0.000000e+00> : vector<2x8xf32>
    %12 = vector.multi_reduction <add>, %11, %cst_5 [2] : vector<2x8x32xf32> to vector<2x8xf32>
    %13 = vector.shape_cast %12 : vector<2x8xf32> to vector<2x8x1xf32>
    %cst_6 = arith.constant 3.200000e+01 : f32
    %14 = vector.broadcast %cst_6 : f32 to vector<2x8x1xf32>
    %15 = arith.divf %13, %14 : vector<2x8x1xf32>
    %cst_7 = arith.constant dense<0.000000e+00> : vector<8x1xf32>
    %16 = vector.multi_reduction <add>, %15, %cst_7 [0] : vector<2x8x1xf32> to vector<8x1xf32>
    %17 = vector.shape_cast %16 : vector<8x1xf32> to vector<1x8x1xf32>
    %cst_8 = arith.constant 2.000000e+00 : f32
    %18 = vector.broadcast %cst_8 : f32 to vector<1x8x1xf32>
    %19 = arith.divf %17, %18 : vector<1x8x1xf32>
    %20 = vector.broadcast %8 : vector<1x8x1xf32> to vector<2x8x32xf32>
    %21 = arith.subf %0, %20 : vector<2x8x32xf32>
    %cst_9 = arith.constant 9.99999974E-6 : f32
    %22 = vector.broadcast %cst_9 : f32 to vector<1x8x1xf32>
    %23 = arith.addf %22, %19 : vector<1x8x1xf32>
    %24 = math.rsqrt %23 : vector<1x8x1xf32>
    %25 = vector.broadcast %24 : vector<1x8x1xf32> to vector<2x8x32xf32>
    %26 = arith.mulf %21, %25 : vector<2x8x32xf32>
    %c0_10 = arith.constant 0 : index
    %c0_11 = arith.constant 0 : index
    %c0_12 = arith.constant 0 : index
    %27 = vector.load %arg2[%c0_10, %c0_11, %c0_12] : memref<2x8x32xf32, #tpu.memory_space<vmem>>, vector<2x8x32xf32>
    tpu.vector_store %arg2[%c0_10, %c0_11, %c0_12], %26 {strides = array<i32>} : memref<2x8x32xf32, #tpu.memory_space<vmem>>, vector<2x8x32xf32>,
    return
  }
  func.func @transform_0(%arg0: i32) -> (i32, i32, i32) {
    %c0_i32 = arith.constant 0 : i32
    %c0_i32_0 = arith.constant 0 : i32
    %c0_i32_1 = arith.constant 0 : i32
    return %c0_i32, %arg0, %c0_i32_0 : i32, i32, i32
  }
  func.func @transform_1(%arg0: i32) -> (i32, i32, i32) {
    %c0_i32 = arith.constant 0 : i32
    %c0_i32_0 = arith.constant 0 : i32
    %c0_i32_1 = arith.constant 0 : i32
    return %c0_i32, %arg0, %c0_i32_0 : i32, i32, i32
  }
}

</mosaic_0001>

<bundles_post_ra>
// kernel: gat_efa_forward.3
= control target key start
LH: loop header
LB: loop body
LE: loop exit
PB: predicated region body
PF: predicated region fallthrough
CT: control target
= control target key end

     0   :  { %s534_s18 = smov 0   ;;  %s566_s0 = inlined_call_operand.vmem [shape: f32[2,8,16], index: 0, kind: input, shape index: {}]   ;;  %s567_s1 = inlined_call_operand.vmem [shape: f32[16,34], index: 1, kind: input, shape index: {}]   ;;  %s568_s2 = inlined_call_operand.vmem [shape: f32[1,34], index: 2, kind: input, shape index: {}]   ;;  %s569_s3 = inlined_call_operand.vmem [shape: f32[2,8,32], index: 3, kind: output, shape index: {0}]   ;;  %s570_s4 = inlined_call_operand.vmem [shape: f32[2,8,1], index: 4, kind: output, shape index: {1}]   ;;  %s571_s5 = inlined_call_operand.vmem [shape: f32[2,8,1], index: 5, kind: output, shape index: {2}]  }
   0x1 LB: > { %s452_s19 = sadd.s32 4294967295, %s497_s18   ;;  %p456_p0 = scmp.ge.s32.totalorder %s497_s18, 1  ;;  %s497_s18 = sphi %s534_s18, %s16_s18  }
   0x2   : > { %p191_p1 = scmp.lt.s32.totalorder %s497_s18, 3 }
   0x4   : > { %p192_p2 = pnand %p456_p0, %p191_p1 }
   0x5   : > { %v242_v0 = vld [vmem:[%s567_s1] sm:$0xff] (!%p192_p2)  ;;  %v243_v1 = vld [vmem:[%s567_s1 + $0x8] sm:$0xff] (!%p192_p2)  ;;  %p225_p3 = scmp.lt.s32.totalorder (!%p192_p2), %s452_s19, 1  ;;  %v499_v2 = vmov (!%p192_p2), 0.0|0.0   ;;  %vm500_vm0 = vmmov (!%p192_p2), 0   ;;  %v501_v4 = vmov (!%p192_p2), 0.0  }
   0x6   : > { %195 = sbr.rel (%p192_p2) target bundleno = 351 (0x15f), region = 32  ;;  %475 = vmatprep.subr.bf16.mxu0 (!%p192_p2), %v499_v2  ;;  %v476_v3 = vpack.c.bf16 (!%p192_p2), %v243_v1, %v242_v0  ;;  %472 = vmatprep.mubr.msk.f32.mxu0 (!%p192_p2), %vm500_vm0, %v501_v4  ;;  %vm251_vm1 = vcmask (!%p192_p2), 130048   ;;  %v461_v6 = vld [vmem:[%s568_s2] ss:$0 sm:$0xff] (!%p192_p2)  ;;  %vm325_vm2 = vcmask (!%p192_p2), 261120   ;;  %s502_s8 = smov (!%p192_p2), 96  }
   0x7   : > { %s503_s9 = smov (!%p192_p2), 95   ;;  %vm331_vm3 = vcmask (!%p192_p2), 7168  }
   0x8   : > { %477 = vmatpush3.bf16.msra.mxu0 (!%p192_p2), %v476_v3 }
   0xd   : > { %s573_s19 = smov (!%p225_p3, %s452_s19), 1 }
   0xe   : > { %s457_s24 = sshll.u32 %s573_s19, 3 }
   0xf   : > { %s228_s27 = scalar_lea.vmem %s566_s0, %s457_s24  ;;  %s232_s7 = scalar_lea.vmem %s569_s3, %s457_s24 }
  0x10   : > { %v241_v5 = vld [vmem:[%s228_s27] sm:$0xff]  ;;  %s236_s12 = scalar_lea.vmem %s570_s4, %s457_s24  ;;  %s240_s15 = scalar_lea.vmem %s571_s5, %s457_s24 }
  0x11   : > { %473 = vmatmul.mubr.msk.f32.vlgmr.msra.gmra.mrb[0].mxu0 %vm251_vm1, %v241_v5 }
  0xe4   : > { %v321_v7 = vpop.f32.mrb[0].mxu0 }
  0xe5   : > { %v322_v8 = vadd.f32 %v461_v6, %v321_v7  ;;  %v474_v9 = vpop.f32.mrb[1].mxu0 }
  0xe7   : > { %326 = vst.msk [vmem:[%s232_s7] sm:$0xff] %vm325_vm2, %v322_v8  ;;  %328 = vrot.lane.b32.xlu0 %v322_v8, %s502_s8 }
  0xeb   : > { %333 = vrot.lane.b32.xlu0 %v322_v8, %s503_s9 }
 0x159   : > { %v329_v10 = vpop.permute.xlu0 %328 }
 0x15a   : > { %332 = vst.msk [vmem:[%s236_s12] sm:$0xff] %vm331_vm3, %v329_v10 }
 0x15d   : > { %v334_v11 = vpop.permute.xlu0 %333 }
 0x15e   : > { %336 = vst.msk [vmem:[%s240_s15] sm:$0xff] %vm331_vm3, %v334_v11 }
 0x15f PF: > { %s16_s18 = sadd.s32 1, %s497_s18  }
 0x160   : > { %p13_p4 = scmp.ge.s32.totalorder %s16_s18, 4  }
 0x162   :  { %15 = sbr.rel (!%p13_p4) target bundleno = 1 (0x1), region = 86 }

// kernel: gat_efa_forward.5
= control target key start
LH: loop header
LB: loop body
LE: loop exit
PB: predicated region body
PF: predicated region fallthrough
CT: control target
= control target key end

     0   :  { %vm11_vm0 = vcmask 261120   ;;  %s126_s0 = inlined_call_operand.vmem [shape: f32[2,8,32], index: 0, kind: input, shape index: {}]   ;;  %s127_s1 = inlined_call_operand.hbm [shape: f32[2,8,32], index: 1, kind: output, shape index: {}]  }
   0x1   :  { %v9_v0 = vld [vmem:[%s126_s0] sm:$0xff]  ;;  %v10_v1 = vld [vmem:[%s126_s0 + $0x8] sm:$0xff] }
   0x2   :  { %6 = vsyncpa [#allocation3], 0  ;;  %v12_v2 = vsel %vm11_vm0, %v9_v0, 0.0  ;;  %v15_v3 = vsel %vm11_vm0, %v10_v1, 0.0  ;;  %s89_s0 = smov [#allocation2]  }
   0x3   :  { %13 = vadd.xlane.f32.xlu0 %v12_v2  ;;  %s49_s10 = sshll.u32 %s89_s0, 4  ;;  %s50_s10 = int_to_ptr.vmem [resolvable:$true] %s49_s10 }
   0x4   :  { %s65_s11 = scalar_lea.vmem %s50_s10, 256  ;;  %p70_p1 = scmp.lt.s32.totalorder %s50_s10, %s50_s10 }
   0x5   :  { %p66_p0 = scmp.ne.s32.totalorder %s50_s10, %s65_s11  ;;  %p71_p2 = scmp.lt.s32.totalorder %s65_s11, %s65_s11 }
   0x7   :  { %16 = vadd.xlane.f32.xlu0 %v15_v3  ;;  %p72_p3 = por %p71_p2, %p70_p1 }
   0x9   :  { %p73_p4 = pnand %p72_p3, %p66_p0 }
  0x90   :  { %v14_v4 = vpop.xlane.xlu0 %13 }
  0x91   :  { %v19_v6 = vmul.f32 0.03125, %v14_v4 }
  0x94   :  { %v17_v5 = vpop.xlane.xlu0 %16 }
  0x95   :  { %v20_v7 = vmul.f32 0.03125, %v17_v5 }
  0x97   :  { %v21_v8 = vadd.f32 %v20_v7, %v19_v6 }
  0x99   :  { %v23_v9 = vmul.f32 0.5, %v21_v8 }
  0x9b   :  { %v25_v10 = vsub.f32 %v10_v1, %v23_v9  ;;  %v24_v11 = vsub.f32 %v9_v0, %v23_v9 }
  0x9d   :  { %v26_v12 = vmul.f32 %v24_v11, %v24_v11  ;;  %v27_v14 = vmul.f32 %v25_v10, %v25_v10 }
  0x9f   :  { %v28_v13 = vsel %vm11_vm0, %v26_v12, 0.0  ;;  %v31_v15 = vsel %vm11_vm0, %v27_v14, 0.0 }
  0xa0   :  { %29 = vadd.xlane.f32.xlu1 %v28_v13 }
  0xa4   :  { %32 = vadd.xlane.f32.xlu1 %v31_v15 }
 0x12d   :  { %v30_v16 = vpop.xlane.xlu1 %29 }
 0x12e   :  { %v34_v18 = vmul.f32 0.03125, %v30_v16 }
 0x131   :  { %v33_v17 = vpop.xlane.xlu1 %32 }
 0x132   :  { %v35_v19 = vmul.f32 0.03125, %v33_v17 }
 0x134   :  { %v36_v20 = vadd.f32 %v35_v19, %v34_v18 }
 0x136   :  { %v37_v21 = vmul.f32 0.5, %v36_v20 }
 0x138   :  { %v38_v22 = vadd.f32 1e-05, %v37_v21 }
 0x13a   :  { %63 = vrsqrt.f32 %v38_v22 }
 0x144   :  { %v64_v23 = vpop.eup %63 }
 0x145   :  { %v40_v24 = vmul.f32 %v64_v23, %v24_v11  ;;  %v41_v25 = vmul.f32 %v64_v23, %v25_v10 }
 0x147   :  { %42 = vst.msk [vmem:[#allocation2] sm:$0xff] %vm11_vm0, %v40_v24  ;;  %43 = vst.msk [vmem:[#allocation2 + $0x8] sm:$0xff] %vm11_vm0, %v41_v25 }
 0x148   :  { %76 = shalt.err (!%p73_p4)
}
 0x149   :  { %s77_s14 = scalar_lea.hbm %s127_s1, 256 }
 0x14a   :  { %p78_p5 = scmp.ne.s32.totalorder %s127_s1, %s77_s14  ;;  %p81_p6 = scmp.lt.u32.totalorder %s77_s14, %s127_s1 }
 0x14c   :  { %p83_p7 = pnand %p81_p6, %p78_p5 }
 0x14e   :  { %86 = shalt.err (!%p83_p7)
}
 0x14f   :  { %s90_s19 = smov 128   ;;  %s91_s20 = smov 8  }
 0x150   :  { %55 = dma.vmem_to_hbm [thread:$0]  %s50_s10, 256, %s127_s1, [#allocation3], %s90_s19, %s90_s19, %s91_s20  }
 0x151   :  { %87 = dma.done.wait [#allocation3], 256  }
 0x152   :  { %88 = vsyncadd [#allocation3], 4294967040 }
 0x153   :  { %59 = vsyncpa [#allocation3], 1 }

// kernel: gat_efa_forward.4
= control target key start
LH: loop header
LB: loop body
LE: loop exit
PB: predicated region body
PF: predicated region fallthrough
CT: control target
= control target key end

     0   :  { %s1738_s11 = smov 0   ;;  %s1740_s12 = smov 0   ;;  %s2090_s0 = inlined_call_operand.vmem [shape: f32[2,8,32], index: 0, kind: input, shape index: {}]   ;;  %s2091_s1 = inlined_call_operand.vmem [shape: f32[2,8,1], index: 1, kind: input, shape index: {}]   ;;  %s2092_s2 = inlined_call_operand.vmem [shape: f32[2,1,8], index: 2, kind: input, shape index: {}]   ;;  %s2093_s3 = inlined_call_operand.vmem [shape: bf16[2,64,8], index: 3, kind: input, shape index: {}]   ;;  %s2094_s4 = inlined_call_operand.vmem [shape: bf16[2,8,8], index: 4, kind: input, shape index: {}]   ;;  %s2095_s5 = inlined_call_operand.vmem [shape: bf16[256,64], index: 5, kind: input, shape index: {}]   ;;  %s2096_s6 = inlined_call_operand.vmem [shape: f32[256,1], index: 6, kind: input, shape index: {}]   ;;  %s2097_s7 = inlined_call_operand.vmem [shape: f32[8,256], index: 7, kind: input, shape index: {}]   ;;  %s2098_s8 = inlined_call_operand.<no memory space> [shape: f32[1,1], index: 8, kind: input, shape index: {}]   ;;  %s2099_s9 = inlined_call_operand.vmem [shape: f32[2,8,32], index: 9, kind: output, shape index: {}]  }
   0x1   :  { %14 = sst [smem:[#allocation3]] %s2098_s8  ;;  %s1742_s13 = smov 0  }
   0x2 LB: > { %s32_s8 = sadd.s32 1, %s1676_s12  ;;  %p1423_p0 = scmp.ge.s32.totalorder %s1680_s13, 1  ;;  %s1680_s13 = sphi %s1742_s13, %s20_s13   ;;  %s1676_s12 = sphi %s1740_s12, %s2101_s12   ;;  %s1672_s11 = sphi %s1738_s11, %s2100_s11  }
   0x3   : > { %p34_p1 = scmp.ge.s32.totalorder %s32_s8, 2  ;;  %p354_p2 = scmp.lt.s32.totalorder %s1680_s13, 3 }
   0x5   : > { %s2103_s8 = smov (%p34_p1, %s32_s8), 0  ;;  %p355_p3 = pnand %p1423_p0, %p354_p2 }
   0x6   : > { %p417_p4 = scmp.lt.s32.totalorder (!%p355_p3), %s1672_s11, 1  ;;  %v1638_v0 = vld [vmem:[%s2095_s5] sm:$0xff] (!%p355_p3)   ;;  %vm797_vm0 = vcmask (!%p355_p3), 523264   ;;  %v1682_v1 = vmov (!%p355_p3), 0   ;;  %v507_v6 = vld [vmem:[%s2096_s6 + $0x88] sm:$0xff] (!%p355_p3)  ;;  %v508_v10 = vld [vmem:[%s2096_s6 + $0x90] sm:$0xff] (!%p355_p3) }
   0x7   : > { %358 = sbr.rel (%p355_p3) target bundleno = 1078 (0x436), region = 56  ;;  %1536 = vmatprep.mubr.msk.bf16.mxu0 (!%p355_p3), %vm797_vm0, %v1638_v0  ;;  %1632 = vset.pattern.permute.xlu0 (!%p355_p3), %v1682_v1  ;;  %v506_v5 = vld [vmem:[%s2096_s6 + $0x80] sm:$0xff] (!%p355_p3)  ;;  %v491_v9 = vld [vmem:[%s2096_s6 + $0x8] sm:$0xff] (!%p355_p3)  ;;  %v509_v11 = vld [vmem:[%s2096_s6 + $0x98] sm:$0xff] (!%p355_p3)  ;;  %s524_s15 = sld [smem:[#allocation3]] (!%p355_p3) }
   0x8   : > { %1633 = vset.pattern.permute.xlu1 (!%p355_p3), %v1682_v1  ;;  %615 = vperm.xlu0 (!%p355_p3), %1632, %v506_v5   ;;  %v490_v7 = vld [vmem:[%s2096_s6] sm:$0xff] (!%p355_p3)  ;;  %v1639_v12 = vld [vmem:[%s2095_s5 + $0x8] sm:$0xff] (!%p355_p3)   ;;  %v492_v13 = vld [vmem:[%s2096_s6 + $0x10] sm:$0xff] (!%p355_p3) }
   0x9   : > { %535 = vperm.xlu1 (!%p355_p3), %1633, %v490_v7   ;;  %v1640_v14 = vld [vmem:[%s2095_s5 + $0x10] sm:$0xff] (!%p355_p3)   ;;  %v493_v15 = vld [vmem:[%s2096_s6 + $0x18] sm:$0xff] (!%p355_p3)  ;;  %v510_v16 = vld [vmem:[%s2096_s6 + $0xa0] sm:$0xff] (!%p355_p3) }
   0xa   : > { %v511_v17 = vld [vmem:[%s2096_s6 + $0xa8] sm:$0xff] (!%p355_p3)  ;;  %v1641_v18 = vld [vmem:[%s2095_s5 + $0x18] sm:$0xff] (!%p355_p3)   ;;  %v494_v19 = vld [vmem:[%s2096_s6 + $0x20] sm:$0xff] (!%p355_p3) }
   0xb   : > { %v1642_v20 = vld [vmem:[%s2095_s5 + $0x20] sm:$0xff] (!%p355_p3)   ;;  %v495_v21 = vld [vmem:[%s2096_s6 + $0x28] sm:$0xff] (!%p355_p3)  ;;  %v512_v22 = vld [vmem:[%s2096_s6 + $0xb0] sm:$0xff] (!%p355_p3) }
   0xc   : > { %620 = vperm.xlu0 (!%p355_p3), %1632, %v507_v6   ;;  %v513_v23 = vld [vmem:[%s2096_s6 + $0xb8] sm:$0xff] (!%p355_p3)  ;;  %v1643_v24 = vld [vmem:[%s2095_s5 + $0x28] sm:$0xff] (!%p355_p3)   ;;  %v496_v25 = vld [vmem:[%s2096_s6 + $0x30] sm:$0xff] (!%p355_p3) }
   0xd   : > { %540 = vperm.xlu1 (!%p355_p3), %1633, %v491_v9   ;;  %v1644_v26 = vld [vmem:[%s2095_s5 + $0x30] sm:$0xff] (!%p355_p3)   ;;  %v497_v27 = vld [vmem:[%s2096_s6 + $0x38] sm:$0xff] (!%p355_p3)  ;;  %v514_v28 = vld [vmem:[%s2096_s6 + $0xc0] sm:$0xff] (!%p355_p3) }
   0xe   : > { %s2105_s11 = smov (!%p417_p4, %s1672_s11), 1  ;;  %v515_v29 = vld [vmem:[%s2096_s6 + $0xc8] sm:$0xff]  ;;  %v1645_v30 = vld [vmem:[%s2095_s5 + $0x38] sm:$0xff]   ;;  %v498_v31 = vld [vmem:[%s2096_s6 + $0x40] sm:$0xff] }
   0xf   : > { %s1470_s16 = sshll.u32 %s2105_s11, 5  ;;  %v1646_v32 = vld [vmem:[%s2095_s5 + $0x40] sm:$0xff]   ;;  %v499_v33 = vld [vmem:[%s2096_s6 + $0x48] sm:$0xff]  ;;  %v516_v34 = vld [vmem:[%s2096_s6 + $0xd0] sm:$0xff]  ;;  %s1907_s14 = sshll.u32 %s2105_s11, 3 }
  0x10   : > { %s439_s19 = scalar_lea.vmem %s2093_s3, %s1470_s16  ;;  %625 = vperm.xlu0 %1632, %v508_v10   ;;  %v517_v35 = vld [vmem:[%s2096_s6 + $0xd8] sm:$0xff]  ;;  %v1647_v36 = vld [vmem:[%s2095_s5 + $0x48] sm:$0xff]   ;;  %v500_v37 = vld [vmem:[%s2096_s6 + $0x50] sm:$0xff]  ;;  %s427_s23 = scalar_lea.vmem %s2091_s1, %s1907_s14 }
  0x11   : > { %v1634_v2 = vld [vmem:[%s439_s19] sm:$0xff]   ;;  %v1635_v3 = vld [vmem:[%s439_s19 + $0x8] sm:$0xff]   ;;  %v1636_v4 = vld [vmem:[%s439_s19 + $0x10] sm:$0xff]   ;;  %630 = vperm.xlu1 %1633, %v509_v11   ;;  %s1428_s16 = sshll.u32 %s2105_s11, 2  ;;  %s430_s22 = scalar_lea.vmem %s2092_s2, %s2105_s11 }
  0x12   : > { %1528 = vmatprep.subr.bf16.mxu0 %v1634_v2  ;;  %v1637_v8 = vld [vmem:[%s439_s19 + $0x18] sm:$0xff]   ;;  %v1648_v38 = vld [vmem:[%s2095_s5 + $0x50] sm:$0xff]   ;;  %v518_v40 = vld [vmem:[%s2096_s6 + $0xe0] sm:$0xff]  ;;  %s447_s19 = scalar_lea.vmem %s2094_s4, %s1428_s16  ;;  %s420_s24 = scalar_lea.vmem %s2090_s0, %s1907_s14 }
  0x13   : > { %1529 = vmatpush3.bf16.msra.mxu0 %v1634_v2  ;;  %v501_v39 = vld [vmem:[%s2096_s6 + $0x58] sm:$0xff]  ;;  %v519_v41 = vld [vmem:[%s2096_s6 + $0xe8] sm:$0xff]  ;;  %v502_v43 = vld [vmem:[%s2096_s6 + $0x60] sm:$0xff]  ;;  %s454_s27 = scalar_lea.vmem %s2099_s9, %s1907_s14 }
  0x14   : > { %1530 = vmatprep.subr.bf16.mxu0 %v1635_v3  ;;  %545 = vperm.xlu0 %1632, %v492_v13   ;;  %v1649_v42 = vld [vmem:[%s2095_s5 + $0x58] sm:$0xff]   ;;  %v1650_v44 = vld [vmem:[%s2095_s5 + $0x60] sm:$0xff]   ;;  %v503_v45 = vld [vmem:[%s2096_s6 + $0x68] sm:$0xff] }
  0x15   : > { %550 = vperm.xlu1 %1633, %v493_v15   ;;  %v520_v46 = vld [vmem:[%s2096_s6 + $0xf0] sm:$0xff]  ;;  %v521_v47 = vld [vmem:[%s2096_s6 + $0xf8] sm:$0xff]  ;;  %v1651_v48 = vld [vmem:[%s2095_s5 + $0x68] sm:$0xff]  }
  0x16   : > { %v504_v49 = vld [vmem:[%s2096_s6 + $0x70] sm:$0xff]  ;;  %v505_v51 = vld [vmem:[%s2096_s6 + $0x78] sm:$0xff]  ;;  %v1179_v52 = vld [vmem:[%s427_s23] sm:$0xff] }
  0x17   : > { %1531 = vmatpush3.bf16.msra.mxu0 %v1635_v3  ;;  %v1652_v50 = vld [vmem:[%s2095_s5 + $0x70] sm:$0xff]   ;;  %v1653_v53 = vld [vmem:[%s2095_s5 + $0x78] sm:$0xff]   ;;  %v523_v58 = vld [vmem:[%s2097_s7 + $0x8] sm:$0xff] }
  0x18   : > { %1532 = vmatprep.subr.bf16.mxu0 %v1636_v4  ;;  %635 = vperm.xlu0 %1632, %v510_v16  }
  0x19   : > { %640 = vperm.xlu1 %1633, %v511_v17   ;;  %1168 = vmatprep.mubr.f32.mxu1 %v523_v58 }
  0x1b   : > { %1533 = vmatpush3.bf16.msra.mxu0 %v1636_v4 }
  0x1c   : > { %1534 = vmatprep.subr.bf16.mxu0 %v1637_v8  ;;  %555 = vperm.xlu0 %1632, %v494_v19  }
  0x1d   : > { %560 = vperm.xlu1 %1633, %v495_v21  }
  0x1f   : > { %1535 = vmatpush3.bf16.msra.mxu0 %v1637_v8 }
  0x20   : > { %645 = vperm.xlu0 %1632, %v512_v22  }
  0x21   : > { %650 = vperm.xlu1 %1633, %v513_v23  }
  0x22   : > { %1537 = vmatmul.mubr.msk.bf16.vlgmr.msra.gmra.mrb[0].mxu0 %vm797_vm0, %v1639_v12 }
  0x23   : > { %1540 = vmatprep.mubr.msk.bf16.mxu0 %vm797_vm0, %v1640_v14 }
  0x24   : > { %565 = vperm.xlu0 %1632, %v496_v25  }
  0x25   : > { %570 = vperm.xlu1 %1633, %v497_v27  }
  0x28   : > { %655 = vperm.xlu0 %1632, %v514_v28  }
  0x29   : > { %660 = vperm.xlu1 %1633, %v515_v29  }
  0x2a   : > { %1541 = vmatmul.mubr.msk.bf16.gmra.mrb[4].mxu0 %vm797_vm0, %v1641_v18 }
  0x2b   : > { %1544 = vmatprep.mubr.msk.bf16.mxu0 %vm797_vm0, %v1642_v20 }
  0x2c   : > { %575 = vperm.xlu0 %1632, %v498_v31  }
  0x2d   : > { %580 = vperm.xlu1 %1633, %v499_v33  }
  0x30   : > { %665 = vperm.xlu0 %1632, %v516_v34  }
  0x31   : > { %670 = vperm.xlu1 %1633, %v517_v35  }
  0x32   : > { %1545 = vmatmul.mubr.msk.bf16.gmra.mrb[8].mxu0 %vm797_vm0, %v1643_v24 }
  0x33   : > { %1548 = vmatprep.mubr.msk.bf16.mxu0 %vm797_vm0, %v1644_v26 }
  0x34   : > { %585 = vperm.xlu0 %1632, %v500_v37  }
  0x35   : > { %590 = vperm.xlu1 %1633, %v501_v39  }
  0x38   : > { %675 = vperm.xlu0 %1632, %v518_v40  }
  0x39   : > { %680 = vperm.xlu1 %1633, %v519_v41  }
  0x3a   : > { %1549 = vmatmul.mubr.msk.bf16.gmra.mrb[12].mxu0 %vm797_vm0, %v1645_v30 }
  0x3b   : > { %1552 = vmatprep.mubr.msk.bf16.mxu0 %vm797_vm0, %v1646_v32 }
  0x3c   : > { %595 = vperm.xlu0 %1632, %v502_v43  }
  0x3d   : > { %600 = vperm.xlu1 %1633, %v503_v45  }
  0x40   : > { %685 = vperm.xlu0 %1632, %v520_v46  }
  0x41   : > { %690 = vperm.xlu1 %1633, %v521_v47  }
  0x42   : > { %1553 = vmatmul.mubr.msk.bf16.gmra.mrb[16].mxu0 %vm797_vm0, %v1647_v36 }
  0x43   : > { %1556 = vmatprep.mubr.msk.bf16.mxu0 %vm797_vm0, %v1648_v38 }
  0x44   : > { %605 = vperm.xlu0 %1632, %v504_v49  }
  0x45   : > { %610 = vperm.xlu1 %1633, %v505_v51  }
  0x48   : > { %1183 = vperm.xlu0 %1632, %v1179_v52  }
  0x4a   : > { %1557 = vmatmul.mubr.msk.bf16.gmra.mrb[20].mxu0 %vm797_vm0, %v1649_v42 }
  0x4b   : > { %1560 = vmatprep.mubr.msk.bf16.mxu0 %vm797_vm0, %v1650_v44 }
  0x52   : > { %1561 = vmatmul.mubr.msk.bf16.gmra.mrb[24].mxu0 %vm797_vm0, %v1651_v48 }
  0x53   : > { %1564 = vmatprep.mubr.msk.bf16.mxu0 %vm797_vm0, %v1652_v50 }
  0x5a   : > { %1565 = vmatmul.mubr.msk.bf16.gmra.mrb[28].mxu0 %vm797_vm0, %v1653_v53 }
  0x87   : > { %v1931_v54 = vpop.permute.xlu0 %615 }
  0x88   : > { %v536_v55 = vpop.permute.xlu1 %535 }
  0x8b   : > { %v1933_v56 = vpop.permute.xlu0 %620 }
  0x8c   : > { %v541_v57 = vpop.permute.xlu1 %540 }
  0x8f   : > { %v1938_v59 = vpop.permute.xlu0 %625 }
  0x90   : > { %v1940_v60 = vpop.permute.xlu1 %630 }
  0x93   : > { %v546_v61 = vpop.permute.xlu0 %545 }
  0x94   : > { %v551_v62 = vpop.permute.xlu1 %550 }
  0x97   : > { %v1942_v63 = vpop.permute.xlu0 %635 }
  0x98   : > { %v1944_v0 = vpop.permute.xlu1 %640 }
  0x9b   : > { %v556_v2 = vpop.permute.xlu0 %555 }
  0x9c   : > { %v561_v3 = vpop.permute.xlu1 %560 }
  0x9f   : > { %v1946_v4 = vpop.permute.xlu0 %645 }
  0xa0   : > { %v1948_v5 = vpop.permute.xlu1 %650 }
  0xa3   : > { %v566_v6 = vpop.permute.xlu0 %565 }
  0xa4   : > { %v571_v7 = vpop.permute.xlu1 %570 }
  0xa7   : > { %v1950_v8 = vpop.permute.xlu0 %655 }
  0xa8   : > { %v1952_v9 = vpop.permute.xlu1 %660 }
  0xab   : > { %v576_v10 = vpop.permute.xlu0 %575 }
  0xac   : > { %v1954_v11 = vpop.permute.xlu1 %580 }
  0xaf   : > { %v1956_v12 = vpop.permute.xlu0 %665 }
  0xb0   : > { %v1958_v13 = vpop.permute.xlu1 %670 }
  0xb3   : > { %v586_v14 = vpop.permute.xlu0 %585 }
  0xb4   : > { %v591_v18 = vpop.permute.xlu1 %590 }
  0xb7   : > { %v1960_v27 = vpop.permute.xlu0 %675 }
  0xb8   : > { %v1966_v31 = vpop.permute.xlu1 %680 }
  0xbb   : > { %v596_v44 = vpop.permute.xlu0 %595 }
  0xbc   : > { %v601_v48 = vpop.permute.xlu1 %600 }
  0xf5   : > { %v1538_v15 = vpop.f32.mrb[0].mxu0 }
  0xf6   : > { %v889_v16 = vadd.f32 %v1538_v15, %v546_v61  ;;  %v880_v17 = vpop.f32.mrb[1].mxu0 }
  0xf7   : > { %v881_v19 = vadd.f32 %v880_v17, %v536_v55  ;;  %v1539_v20 = vpop.f32.mrb[2].mxu0  ;;  %v1990_v17 = vpop.permute.xlu1 %690 }
  0xf8   : > { %v1041_v21 = vmul.f32 0.2, %v889_v16  ;;  %v892_v22 = vadd.f32 %v1539_v20, %v551_v62  ;;  %v883_v23 = vpop.f32.mrb[3].mxu0  ;;  %vm1009_vm1 = vcmp.gt.f32.partialorder %v889_v16, 0.0 }
  0xf9   : > { %v1039_v24 = vmul.f32 0.2, %v881_v19  ;;  %v884_v25 = vadd.f32 %v883_v23, %v541_v57  ;;  %vm1007_vm3 = vcmp.gt.f32.partialorder %v881_v19, 0.0 }
  0xfa   : > { %vm1010_vm2 = vcmp.gt.f32.partialorder %v892_v22, 0.0  ;;  %v1042_v26 = vmul.f32 0.2, %v892_v22  ;;  %v1962_v29 = vsel %vm1009_vm1, %v889_v16, %v1041_v21 }
  0xfb   : > { %v1040_v28 = vmul.f32 0.2, %v884_v25  ;;  %vm1008_vm4 = vcmp.gt.f32.partialorder %v884_v25, 0.0  ;;  %v1968_v33 = vsel %vm1007_vm3, %v881_v19, %v1039_v24 }
  0xfc   : > { %v1964_v30 = vsel %vm1010_vm2, %v892_v22, %v1042_v26 }
  0xfd   : > { %v1542_v32 = vpop.f32.mrb[4].mxu0  ;;  %v1970_v34 = vsel %vm1008_vm4, %v884_v25, %v1040_v28  ;;  %v1579_v35 = vpack.c.bf16 %v1964_v30, %v1962_v29 }
  0xfe   : > { %v905_v36 = vadd.f32 %v1542_v32, %v566_v6  ;;  %v896_v37 = vpop.f32.mrb[5].mxu0  ;;  %v1575_v38 = vpack.c.bf16 %v1970_v34, %v1968_v33 }
  0xff   : > { %v897_v39 = vadd.f32 %v896_v37, %v556_v2  ;;  %v1543_v40 = vpop.f32.mrb[6].mxu0  ;;  %v1988_v2 = vpop.permute.xlu0 %685 }
 0x100   : > { %v1045_v41 = vmul.f32 0.2, %v905_v36  ;;  %v908_v42 = vadd.f32 %v1543_v40, %v571_v7  ;;  %v899_v43 = vpop.f32.mrb[7].mxu0  ;;  %vm1013_vm5 = vcmp.gt.f32.partialorder %v905_v36, 0.0 }
 0x101   : > { %v1043_v45 = vmul.f32 0.2, %v897_v39  ;;  %v900_v46 = vadd.f32 %v899_v43, %v561_v3  ;;  %vm1011_vm6 = vcmp.gt.f32.partialorder %v897_v39, 0.0 }
 0x102   : > { %vm1014_vm7 = vcmp.gt.f32.partialorder %v908_v42, 0.0  ;;  %v1046_v47 = vmul.f32 0.2, %v908_v42  ;;  %v1976_v50 = vsel %vm1013_vm5, %v905_v36, %v1045_v41  ;;  %v611_v36 = vpop.permute.xlu1 %610 }
 0x103   : > { %vm1012_vm8 = vcmp.gt.f32.partialorder %v900_v46, 0.0  ;;  %v1044_v49 = vmul.f32 0.2, %v900_v46  ;;  %v1980_v53 = vsel %vm1011_vm6, %v897_v39, %v1043_v45 }
 0x104   : > { %v1978_v51 = vsel %vm1014_vm7, %v908_v42, %v1046_v47 }
 0x105   : > { %v1546_v52 = vpop.f32.mrb[8].mxu0  ;;  %v1982_v55 = vsel %vm1012_vm8, %v900_v46, %v1044_v49  ;;  %v1587_v57 = vpack.c.bf16 %v1978_v51, %v1976_v50 }
 0x106   : > { %v921_v58 = vadd.f32 %v1546_v52, %v586_v14  ;;  %v912_v61 = vpop.f32.mrb[9].mxu0  ;;  %v1583_v62 = vpack.c.bf16 %v1982_v55, %v1980_v53 }
 0x107   : > { %v913_v3 = vadd.f32 %v912_v61, %v576_v10  ;;  %v1547_v6 = vpop.f32.mrb[10].mxu0  ;;  %v606_v10 = vpop.permute.xlu0 %605 }
 0x108   : > { %v1049_v7 = vmul.f32 0.2, %v921_v58  ;;  %v924_v15 = vadd.f32 %v1547_v6, %v591_v18  ;;  %v915_v16 = vpop.f32.mrb[11].mxu0  ;;  %vm1017_vm9 = vcmp.gt.f32.partialorder %v921_v58, 0.0 }
 0x109   : > { %v1047_v19 = vmul.f32 0.2, %v913_v3  ;;  %v916_v20 = vadd.f32 %v915_v16, %v1954_v11  ;;  %vm1015_vm10 = vcmp.gt.f32.partialorder %v913_v3, 0.0 }
 0x10a   : > { %vm1018_vm11 = vcmp.gt.f32.partialorder %v924_v15, 0.0  ;;  %v1050_v14 = vmul.f32 0.2, %v924_v15  ;;  %v1993_v22 = vsel %vm1017_vm9, %v921_v58, %v1049_v7 }
 0x10b   : > { %vm1016_vm12 = vcmp.gt.f32.partialorder %v916_v20, 0.0  ;;  %v1048_v21 = vmul.f32 0.2, %v916_v20  ;;  %v1997_v25 = vsel %vm1015_vm10, %v913_v3, %v1047_v19 }
 0x10c   : > { %v1995_v23 = vsel %vm1018_vm11, %v924_v15, %v1050_v14 }
 0x10d   : > { %v1550_v24 = vpop.f32.mrb[12].mxu0  ;;  %v1999_v18 = vsel %vm1016_vm12, %v916_v20, %v1048_v21  ;;  %v1595_v26 = vpack.c.bf16 %v1995_v23, %v1993_v22  ;;  %v522_v22 = vld [vmem:[%s2097_s7] sm:$0xff] }
 0x10e   : > { %v937_v28 = vadd.f32 %v1550_v24, %v606_v10  ;;  %v928_v11 = vpop.f32.mrb[13].mxu0  ;;  %v1591_v32 = vpack.c.bf16 %v1999_v18, %v1997_v25  ;;  %v1103_v25 = vstv %s524_s15 }
 0x10f   : > { %v929_v37 = vadd.f32 %v928_v11, %v596_v44  ;;  %v1551_v39 = vpop.f32.mrb[14].mxu0 }
 0x110   : > { %v1053_v40 = vmul.f32 0.2, %v937_v28  ;;  %v940_v41 = vadd.f32 %v1551_v39, %v611_v36  ;;  %v931_v42 = vpop.f32.mrb[15].mxu0  ;;  %vm1021_vm13 = vcmp.gt.f32.partialorder %v937_v28, 0.0 }
 0x111   : > { %v1051_v43 = vmul.f32 0.2, %v929_v37  ;;  %v932_v45 = vadd.f32 %v931_v42, %v601_v48  ;;  %vm1019_vm14 = vcmp.gt.f32.partialorder %v929_v37, 0.0 }
 0x112   : > { %vm1022_vm15 = vcmp.gt.f32.partialorder %v940_v41, 0.0  ;;  %v1054_v46 = vmul.f32 0.2, %v940_v41  ;;  %v2005_v49 = vsel %vm1021_vm13, %v937_v28, %v1053_v40 }
 0x113   : > { %vm1020_vm0 = vcmp.gt.f32.partialorder %v932_v45, 0.0  ;;  %v1052_v47 = vmul.f32 0.2, %v932_v45  ;;  %v2009_v61 = vsel %vm1019_vm14, %v929_v37, %v1051_v43 }
 0x114   : > { %v2007_v52 = vsel %vm1022_vm15, %v940_v41, %v1054_v46 }
 0x115   : > { %v1554_v58 = vpop.f32.mrb[16].mxu0  ;;  %v2011_v44 = vsel %vm1020_vm0, %v932_v45, %v1052_v47  ;;  %v1603_v3 = vpack.c.bf16 %v2007_v52, %v2005_v49  ;;  %v1466_v52 = vld [vmem:[%s430_s22] ss:$0 sm:$0xff] }
 0x116   : > { %v953_v6 = vadd.f32 %v1554_v58, %v1938_v59  ;;  %v944_v48 = vpop.f32.mrb[17].mxu0  ;;  %v1599_v7 = vpack.c.bf16 %v2011_v44, %v2009_v61  ;;  %v1184_v61 = vpop.permute.xlu0 %1183 }
 0x117   : > { %v945_v15 = vadd.f32 %v944_v48, %v1931_v54  ;;  %v1555_v16 = vpop.f32.mrb[18].mxu0 }
 0x118   : > { %v1057_v19 = vmul.f32 0.2, %v953_v6  ;;  %v956_v20 = vadd.f32 %v1555_v16, %v1940_v60  ;;  %v947_v14 = vpop.f32.mrb[19].mxu0  ;;  %vm1025_vm1 = vcmp.gt.f32.partialorder %v953_v6, 0.0 }
 0x119   : > { %v1055_v21 = vmul.f32 0.2, %v945_v15  ;;  %v948_v10 = vadd.f32 %v947_v14, %v1933_v56  ;;  %vm1023_vm3 = vcmp.gt.f32.partialorder %v945_v15, 0.0 }
 0x11a   : > { %vm1026_vm2 = vcmp.gt.f32.partialorder %v956_v20, 0.0  ;;  %v1058_v24 = vmul.f32 0.2, %v956_v20  ;;  %v1089_v59 = vsel %vm1025_vm1, %v953_v6, %v1057_v19 }
 0x11b   : > { %v1056_v28 = vmul.f32 0.2, %v948_v10  ;;  %vm1024_vm4 = vcmp.gt.f32.partialorder %v948_v10, 0.0  ;;  %v1087_v37 = vsel %vm1023_vm3, %v945_v15, %v1055_v21 }
 0x11c   : > { %v1090_v11 = vsel %vm1026_vm2, %v956_v20, %v1058_v24  ;;  %vm1177_vm2 = vcmask 64512  }
 0x11d   : > { %v1558_v36 = vpop.f32.mrb[20].mxu0  ;;  %v1088_v39 = vsel %vm1024_vm4, %v948_v10, %v1056_v28  ;;  %v1577_v54 = vpack.c.bf16 %v1090_v11, %v1089_v59 }
 0x11e   : > { %v969_v40 = vadd.f32 %v1558_v36, %v1946_v4  ;;  %v960_v41 = vpop.f32.mrb[21].mxu0  ;;  %v1573_v60 = vpack.c.bf16 %v1088_v39, %v1087_v37 }
 0x11f   : > { %v961_v42 = vadd.f32 %v960_v41, %v1942_v63  ;;  %v1559_v43 = vpop.f32.mrb[22].mxu0 }
 0x120   : > { %v1061_v45 = vmul.f32 0.2, %v969_v40  ;;  %v972_v56 = vadd.f32 %v1559_v43, %v1948_v5  ;;  %v963_v46 = vpop.f32.mrb[23].mxu0  ;;  %1574 = vmatprep.subr.bf16.mxu1 %v1573_v60  ;;  %vm1029_vm5 = vcmp.gt.f32.partialorder %v969_v40, 0.0 }
 0x121   : > { %v1059_v47 = vmul.f32 0.2, %v961_v42  ;;  %v964_v58 = vadd.f32 %v963_v46, %v1944_v0  ;;  %1576 = vmatpush3.bf16.msra.mxu1 %v1575_v38  ;;  %vm1027_vm6 = vcmp.gt.f32.partialorder %v961_v42, 0.0 }
 0x122   : > { %vm1030_vm7 = vcmp.gt.f32.partialorder %v972_v56, 0.0  ;;  %v1062_v4 = vmul.f32 0.2, %v972_v56  ;;  %1578 = vmatprep.subr.bf16.mxu1 %v1577_v54  ;;  %v1093_v6 = vsel %vm1029_vm5, %v969_v40, %v1061_v45 }
 0x123   : > { %vm1028_vm8 = vcmp.gt.f32.partialorder %v964_v58, 0.0  ;;  %v1060_v63 = vmul.f32 0.2, %v964_v58  ;;  %v1091_v5 = vsel %vm1027_vm6, %v961_v42, %v1059_v47  ;;  %vm1684_vm6 = vmmov 0  }
 0x124   : > { %v1094_v48 = vsel %vm1030_vm7, %v972_v56, %v1062_v4  ;;  %vm1289_vm7 = vcmask 261120  }
 0x125   : > { %v1562_v15 = vpop.f32.mrb[24].mxu0  ;;  %1580 = vmatpush3.bf16.msra.mxu1 %v1579_v35  ;;  %v1092_v16 = vsel %vm1028_vm8, %v964_v58, %v1060_v63  ;;  %v1585_v0 = vpack.c.bf16 %v1094_v48, %v1093_v6 }
 0x126   : > { %v985_v19 = vadd.f32 %v1562_v15, %v1956_v12  ;;  %v976_v33 = vpop.f32.mrb[25].mxu0  ;;  %v1581_v34 = vpack.c.bf16 %v1092_v16, %v1091_v5  ;;  %v1683_v5 = vmov 0.0   ;;  %v1215_v16 = vld [vmem:[%s420_s24] sm:$0xff] }
 0x127   : > { %v977_v38 = vadd.f32 %v976_v33, %v1950_v8  ;;  %v1563_v20 = vpop.f32.mrb[26].mxu0 }
 0x128   : > { %v1065_v14 = vmul.f32 0.2, %v985_v19  ;;  %v988_v21 = vadd.f32 %v1563_v20, %v1958_v13  ;;  %v979_v10 = vpop.f32.mrb[27].mxu0  ;;  %1582 = vmatprep.subr.bf16.mxu1 %v1581_v34  ;;  %vm1033_vm9 = vcmp.gt.f32.partialorder %v985_v19, 0.0 }
 0x129   : > { %v1063_v24 = vmul.f32 0.2, %v977_v38  ;;  %v980_v29 = vadd.f32 %v979_v10, %v1952_v9  ;;  %1584 = vmatpush3.bf16.msra.mxu1 %v1583_v62  ;;  %vm1031_vm10 = vcmp.gt.f32.partialorder %v977_v38, 0.0 }
 0x12a   : > { %vm1034_vm11 = vcmp.gt.f32.partialorder %v988_v21, 0.0  ;;  %v1066_v12 = vmul.f32 0.2, %v988_v21  ;;  %1586 = vmatprep.subr.bf16.mxu1 %v1585_v0  ;;  %v1097_v30 = vsel %vm1033_vm9, %v985_v19, %v1065_v14 }
 0x12b   : > { %vm1032_vm12 = vcmp.gt.f32.partialorder %v980_v29, 0.0  ;;  %v1064_v8 = vmul.f32 0.2, %v980_v29  ;;  %v1095_v13 = vsel %vm1031_vm10, %v977_v38, %v1063_v24 }
 0x12c   : > { %v1098_v35 = vsel %vm1034_vm11, %v988_v21, %v1066_v12 }
 0x12d   : > { %v1566_v28 = vpop.f32.mrb[28].mxu0  ;;  %1588 = vmatpush3.bf16.msra.mxu1 %v1587_v57  ;;  %v1096_v59 = vsel %vm1032_vm12, %v980_v29, %v1064_v8  ;;  %v1593_v9 = vpack.c.bf16 %v1098_v35, %v1097_v30 }
 0x12e   : > { %v1001_v11 = vadd.f32 %v1566_v28, %v1988_v2  ;;  %v992_v53 = vpop.f32.mrb[29].mxu0  ;;  %v1589_v55 = vpack.c.bf16 %v1096_v59, %v1095_v13 }
 0x12f   : > { %v993_v62 = vadd.f32 %v992_v53, %v1960_v27  ;;  %v1567_v36 = vpop.f32.mrb[30].mxu0 }
 0x130   : > { %v1069_v37 = vmul.f32 0.2, %v1001_v11  ;;  %v1004_v39 = vadd.f32 %v1567_v36, %v1990_v17  ;;  %v995_v54 = vpop.f32.mrb[31].mxu0  ;;  %1590 = vmatprep.subr.bf16.mxu1 %v1589_v55  ;;  %vm1037_vm13 = vcmp.gt.f32.partialorder %v1001_v11, 0.0 }
 0x131   : > { %v1067_v40 = vmul.f32 0.2, %v993_v62  ;;  %v996_v50 = vadd.f32 %v995_v54, %v1966_v31  ;;  %1592 = vmatpush3.bf16.msra.mxu1 %v1591_v32  ;;  %vm1035_vm14 = vcmp.gt.f32.partialorder %v993_v62, 0.0  ;;  %v1198_v32 = vld [vmem:[%s447_s19] sm:$0xf] }
 0x132   : > { %vm1038_vm15 = vcmp.gt.f32.partialorder %v1004_v39, 0.0  ;;  %v1070_v51 = vmul.f32 0.2, %v1004_v39  ;;  %1594 = vmatprep.subr.bf16.mxu1 %v1593_v9  ;;  %v1101_v57 = vsel %vm1037_vm13, %v1001_v11, %v1069_v37  ;;  %vm1199_vm3 = vcmp.gt.bf16.partialorder %v1198_v32, 0 }
 0x133   : > { %vm1036_vm0 = vcmp.gt.f32.partialorder %v996_v50, 0.0  ;;  %v1068_v27 = vmul.f32 0.2, %v996_v50  ;;  %v1099_v17 = vsel %vm1035_vm14, %v993_v62, %v1067_v40  ;;  %v1200_v42 = vsel %vm1199_vm3, 65537, %v1682_v1 }
 0x134   : > { %v1102_v2 = vsel %vm1038_vm15, %v1004_v39, %v1070_v51  ;;  %v1201_v45 = vunpack.c.l.b16 %v1200_v42 }
 0x135   : > { %1596 = vmatpush3.bf16.msra.mxu1 %v1595_v26  ;;  %v1100_v31 = vsel %vm1036_vm0, %v996_v50, %v1068_v27  ;;  %v1601_v41 = vpack.c.bf16 %v1102_v2, %v1101_v57 }
 0x136   : > { %v1597_v60 = vpack.c.bf16 %v1100_v31, %v1099_v17  ;;  %vm1202_vm5 = vcmp.ne.s32.totalorder %v1201_v45, 0 }
 0x138   : > { %1598 = vmatprep.subr.bf16.mxu1 %v1597_v60 }
 0x139   : > { %1600 = vmatpush3.bf16.msra.mxu1 %v1599_v7 }
 0x13a   : > { %1602 = vmatprep.subr.bf16.mxu1 %v1601_v41 }
 0x13d   : > { %1604 = vmatpush3.bf16.msra.mxu1 %v1603_v3  ;;  %v1192_v3 = vadd.f32 %v1466_v52, %v1184_v61 }
 0x13e   : > { %1568 = vmatprep.subr.mxu1 %v1683_v5 }
 0x13f   : > { %v1194_v43 = vmul.f32 0.2, %v1192_v3  ;;  %vm1193_vm4 = vcmp.gt.f32.partialorder %v1192_v3, 0.0 }
 0x140   : > { %1169 = vmatmul.mubr.f32.vlgmr.msra.gmra.mrb[0].mxu1 %v522_v22 }
 0x141   : > { %v1195_v56 = vsel %vm1193_vm4, %v1192_v3, %v1194_v43  ;;  %1569 = vmatpush3.msra.mxu1 %v1215_v16  ;;  %1570 = vmatprep.mubr.msk.f32.mxu1 %vm1684_vm6, %v1683_v5 }
 0x213   : > { %v1523_v23 = vpop.f32.mrb[0].mxu1 }
 0x214   : > { %v1524_v18 = vpop.f32.mrb[1].mxu1 }
 0x215   : > { %v1525_v26 = vadd.f32 %v1524_v18, %v1523_v23 }
 0x217   : > { %v1171_v49 = vadd.f32 %v1525_v26, %v1103_v25 }
 0x219   : > { %vm1174_vm1 = vcmp.gt.f32.partialorder %v1171_v49, 0.0  ;;  %v1175_v44 = vmul.f32 0.2, %v1171_v49 }
 0x21b   : > { %v1176_v7 = vsel %vm1174_vm1, %v1171_v49, %v1175_v44 }
 0x21c   : > { %1178 = vst.msk [vmem:[#allocation2] sm:$0xff] %vm1177_vm2, %v1176_v7 }
 0x223   : > { %v1196_v46 = vld [vmem:[#allocation2] sm:$0xff] }
 0x224   : > { %v1197_v47 = vadd.f32 %v1196_v46, %v1195_v56 }
 0x226   : > { %v1203_v58 = vsel %vm1202_vm5, %v1197_v47, -9e+15 }
 0x227   : > { %v1204_v4 = vsel %vm1177_vm2, %v1203_v58, -inf }
 0x228   : > { %1205 = vmax.xlane.f32.xlu1 %v1204_v4 }
 0x2b5   : > { %v1206_v63 = vpop.xlane.xlu1 %1205 }
 0x2b6   : > { %v1207_v6 = vsub.f32 %v1203_v58, %v1206_v63 }
 0x2b8   : > { %v1208_v48 = vmul.f32 1.442695, %v1207_v6 }
 0x2ba   : > { %1654 = vpow2.f32 %v1208_v48 }
 0x2c4   : > { %v1655_v15 = vpop.eup %1654 }
 0x2c5   : > { %v1210_v1 = vsel %vm1177_vm2, %v1655_v15, 0.0 }
 0x2c6   : > { %1211 = vadd.xlane.f32.xlu0 %v1210_v1 }
 0x353   : > { %v1212_v0 = vpop.xlane.xlu0 %1211 }
 0x354   : > { %1656 = vrcp.f32 %v1212_v0 }
 0x35e   : > { %v1657_v19 = vpop.eup %1656 }
 0x35f   : > { %v1214_v33 = vmul.f32 %v1657_v19, %v1655_v15 }
 0x361   : > { %1571 = vmatmul.mubr.msk.f32.vlgmr.msra.gmra.mrb[2].mxu1 %vm1177_vm2, %v1214_v33 }
 0x434   : > { %v1285_v34 = vpop.f32.mrb[2].mxu1 }
 0x435   : > { %1290 = vst.msk [vmem:[%s454_s27] sm:$0xff] %vm1289_vm7, %v1285_v34  ;;  %v1572_v38 = vpop.f32.mrb[3].mxu1 }
 0x436 PF: > { %s20_s13 = sadd.s32 1, %s1680_s13   ;;  %s2100_s11 = smov %s1676_s12 }
 0x437   : > { %p17_p5 = scmp.ge.s32.totalorder %s20_s13, 4   ;;  %s2101_s12 = smov %s2103_s8 }
 0x439   :  { %19 = sbr.rel (!%p17_p5) target bundleno = 2 (0x2), region = 98 }

</bundles_post_ra>
